<compile_context>
chip_gen: v7x
topology: tpu7x:2x2x1
jax: 0.10.0
libtpu: 0.0.40
codegen_flags: <defaults>
</compile_context>

<pallas_src>
import math
import functools

import jax
import jax.numpy as jnp
from jax.experimental import pallas as pl
from jax.experimental.pallas import tpu as pltpu


def _hash_u32(x):
    """Wang hash: cheap, well-mixed 32-bit hash (pure VPU integer ops)."""
    x = (x ^ jnp.uint32(61)) ^ (x >> jnp.uint32(16))
    x = x * jnp.uint32(9)
    x = x ^ (x >> jnp.uint32(4))
    x = x * jnp.uint32(0x27D4EB2D)
    x = x ^ (x >> jnp.uint32(15))
    return x


def _pe_dropout_kernel(seed_ref, x_ref, pe_ref, o_ref, *, p, s_total, tile_s):
    """x_ref/o_ref: (TS, D) row-tile of one batch element; pe_ref: (TS, D)."""
    y = x_ref[...].astype(jnp.float32) + pe_ref[...].astype(jnp.float32)

    if p > 0.0:
        b = pl.program_id(0)
        j = pl.program_id(1)
        ts, d = y.shape

        # Global (batch, position) row index and column index of every element.
        row0 = b * s_total + j * tile_s
        row_idx = (row0 + jax.lax.broadcasted_iota(jnp.int32, (ts, d), 0)).astype(jnp.uint32)
        col_idx = jax.lax.broadcasted_iota(jnp.int32, (ts, d), 1).astype(jnp.uint32)

        seed = seed_ref[0].astype(jnp.uint32)
        h = _hash_u32(row_idx ^ (seed * jnp.uint32(0x9E3779B9)))
        h = _hash_u32(h ^ col_idx)

        # Inverted dropout: keep with prob (1 - p), scale kept by 1/(1-p).
        threshold = jnp.uint32(min(int(round(p * (2.0 ** 32))), 0xFFFFFFFF))
        keep = h >= threshold
        y = jnp.where(keep, y * jnp.float32(1.0 / (1.0 - p)), jnp.zeros_like(y))

    o_ref[...] = y.astype(o_ref.dtype)


def make_sinusoidal_pe(d_model: int, max_len: int = 5000) -> jnp.ndarray:
    """Deterministic buffer, identical math to the PyTorch __init__."""
    position = jnp.arange(max_len, dtype=jnp.float32)[:, None]           # (max_len, 1)
    div_term = jnp.exp(
        jnp.arange(0, d_model, 2, dtype=jnp.float32)
        * (-math.log(10000.0) / d_model)
    )                                                                     # (d_model/2,)
    pe = jnp.zeros((max_len, d_model), dtype=jnp.float32)
    pe = pe.at[:, 0::2].set(jnp.sin(position * div_term))
    pe = pe.at[:, 1::2].set(jnp.cos(position * div_term))
    return pe                                                             # (max_len, d_model)


def _choose_row_tile(S: int, D: int, itemsize: int, target_bytes: int = 2 << 20) -> int:
    """Largest row tile that (a) divides S, (b) is a multiple of 8 (sublane),
    and (c) keeps the per-buffer tile around `target_bytes`; falls back to S
    (a full-extent block is always legal)."""
    max_rows = max(8, target_bytes // max(1, D * itemsize))
    if S <= max_rows:
        return S
    best = None
    t = 8
    while t <= max_rows:
        if S % t == 0:
            best = t
        t += 8
    return best if best is not None else S


def positional_encoding_forward(x, pe, *, dropout_p=0.1, seed=0, deterministic=False):
    """x: [B, S, D] -> [B, S, D]."""
    B, S, D = x.shape
    p_eff = 0.0 if deterministic else float(dropout_p)

    # torch.nn.Dropout(p=1.0) zeroes everything; avoid uint32 threshold overflow.
    if p_eff >= 1.0:
        return jnp.zeros_like(x)

    itemsize = jnp.dtype(x.dtype).itemsize
    pe_s = pe[:S, :].astype(x.dtype)          # narrow dtype -> half the HBM bytes for bf16
    TS = _choose_row_tile(S, D, itemsize)
    num_s_tiles = S // TS

    # NOTE: if the same `seed` is reused across layers/calls the dropout masks
    # repeat; callers should mix in a per-call/layer salt into `seed`.
    seed_arr = jnp.array([int(seed)], dtype=jnp.int32)
    kernel = functools.partial(_pe_dropout_kernel, p=p_eff, s_total=S, tile_s=TS)

    # Rough VMEM budget: double-buffered x / out / pe tiles + f32 temporaries.
    tile_bytes = TS * D * itemsize
    vmem_limit = int(min(max(8 * tile_bytes + (2 << 20), 4 << 20), 64 << 20))

    cost = pl.CostEstimate(
        flops=x.size,                                   # one add (+ cheap select) per element
        transcendentals=0,
        bytes_accessed=2 * x.size * itemsize + pe_s.size * itemsize,
    )

    return pl.pallas_call(
        kernel,
        out_shape=jax.ShapeDtypeStruct((B, S, D), x.dtype),
        grid_spec=pltpu.PrefetchScalarGridSpec(
            num_scalar_prefetch=1,                      # seed lands in SMEM
            grid=(B, num_s_tiles),
            in_specs=[
                # one (TS, D) row-tile of one batch element per grid step
                pl.BlockSpec((pl.Squeezed(), TS, D), lambda b, j, seed: (b, j, 0)),
                # matching pe row-tile (shared across the batch axis)
                pl.BlockSpec((TS, D), lambda b, j, seed: (j, 0)),
            ],
            out_specs=pl.BlockSpec((pl.Squeezed(), TS, D), lambda b, j, seed: (b, j, 0)),
        ),
        compiler_params=pltpu.CompilerParams(
            # Stateless hash dropout -> no cross-step state; both axes can be
            # sharded across v7x's two TensorCores (no-op on v5e/v6e).
            dimension_semantics=("parallel", "parallel"),
            vmem_limit_bytes=vmem_limit,
        ),
        cost_estimate=cost,
    )(seed_arr, x, pe_s)


if __name__ == "__main__":
    # Small shapes consistent with the module's forward: [batch, seq, embed]
    # TODO(synk): for D < 128 (as in this demo) the output stores are masked
    # partial stores; real transformer D (multiple of 128) is lane-dense.
    B, S, D = 2, 8, 32
    d_model, max_len = D, 64          # keep the buffer small for the demo

    key = jax.random.PRNGKey(0)
    x = jax.random.normal(key, (B, S, D), dtype=jnp.float32)

    pe = make_sinusoidal_pe(d_model, max_len)

    # 1) deterministic (eval-mode dropout == identity): verify exactly against reference
    y_eval = positional_encoding_forward(x, pe, dropout_p=0.1, deterministic=True)
    y_eval = jax.block_until_ready(y_eval)
    ref = x + pe[:S, :][None, :, :]
    assert y_eval.shape == (B, S, D)
    assert jnp.allclose(y_eval, ref, atol=1e-6, rtol=1e-6), "eval-mode mismatch"

    # 2) training-mode dropout path (p=0.1): every output element is either 0
    #    or ref / (1 - p)  (inverted-dropout semantics of torch.nn.Dropout).
    p = 0.1
    y_train = positional_encoding_forward(x, pe, dropout_p=p, seed=1234,
                                          deterministic=False)
    y_train = jax.block_until_ready(y_train)
    scaled = ref / (1.0 - p)
    is_zero = jnp.isclose(y_train, 0.0, atol=1e-6)
    is_scaled = jnp.isclose(y_train, scaled, atol=1e-5, rtol=1e-5)
    assert bool(jnp.all(is_zero | is_scaled)), "training-mode dropout mismatch"

    print("KERNEL_OK")
</pallas_src>

<mosaic_0001>
module attributes {stable_mosaic.version = 11 : i64} {
  func.func @_pe_dropout_kernel(%arg0: i32, %arg1: i32, %arg2: memref<1xi32, #tpu.memory_space<smem>>, %arg3: memref<1x8x32xf32, #tpu.memory_space<vmem>>, %arg4: memref<8x32xf32, #tpu.memory_space<vmem>>, %arg5: memref<1x8x32xf32, #tpu.memory_space<vmem>>) attributes {dimension_semantics = [#tpu.dimension_semantics<parallel>, #tpu.dimension_semantics<parallel>], iteration_bounds = array<i64: 2, 1>, scalar_prefetch = 1 : i64, scratch_operands = 0 : i64, tpu.core_type = #tpu.core_type<tc>, window_params = [{transform_indices = @transform_0, window_bounds = array<i64: 1, 8, 32>}, {transform_indices = @transform_1, window_bounds = array<i64: 8, 32>}, {transform_indices = @transform_2, window_bounds = array<i64: 1, 8, 32>}]} {
    %c0 = arith.constant 0 : index
    %c0_0 = arith.constant 0 : index
    %c0_1 = arith.constant 0 : index
    %0 = vector.load %arg3[%c0, %c0_0, %c0_1] : memref<1x8x32xf32, #tpu.memory_space<vmem>>, vector<1x8x32xf32>
    %1 = vector.shape_cast %0 : vector<1x8x32xf32> to vector<8x32xf32>
    %c0_2 = arith.constant 0 : index
    %c0_3 = arith.constant 0 : index
    %2 = vector.load %arg4[%c0_2, %c0_3] : memref<8x32xf32, #tpu.memory_space<vmem>>, vector<8x32xf32>
    %3 = arith.addf %1, %2 : vector<8x32xf32>
    %c0_4 = arith.constant 0 : index
    %c0_5 = arith.constant 0 : index
    %c0_6 = arith.constant 0 : index
    %4 = vector.load %arg5[%c0_4, %c0_5, %c0_6] : memref<1x8x32xf32, #tpu.memory_space<vmem>>, vector<1x8x32xf32>
    %5 = vector.shape_cast %4 : vector<1x8x32xf32> to vector<8x32xf32>
    %6 = vector.shape_cast %3 : vector<8x32xf32> to vector<1x8x32xf32>
    tpu.vector_store %arg5[%c0_4, %c0_5, %c0_6], %6 {strides = array<i32>} : memref<1x8x32xf32, #tpu.memory_space<vmem>>, vector<1x8x32xf32>,
    return
  }
  func.func @transform_0(%arg0: i32, %arg1: i32, %arg2: memref<1xi32, #tpu.memory_space<smem>>) -> (i32, i32, i32) {
    %c0_i32 = arith.constant 0 : i32
    %c0_i32_0 = arith.constant 0 : i32
    return %arg0, %arg1, %c0_i32 : i32, i32, i32
  }
  func.func @transform_1(%arg0: i32, %arg1: i32, %arg2: memref<1xi32, #tpu.memory_space<smem>>) -> (i32, i32) {
    %c0_i32 = arith.constant 0 : i32
    %c0_i32_0 = arith.constant 0 : i32
    return %arg1, %c0_i32 : i32, i32
  }
  func.func @transform_2(%arg0: i32, %arg1: i32, %arg2: memref<1xi32, #tpu.memory_space<smem>>) -> (i32, i32, i32) {
    %c0_i32 = arith.constant 0 : i32
    %c0_i32_0 = arith.constant 0 : i32
    return %arg0, %arg1, %c0_i32 : i32, i32, i32
  }
}

</mosaic_0001>

<bundles_post_ra>
// kernel: tpu_custom_call.1
= control target key start
LH: loop header
LB: loop body
LE: loop exit
PB: predicated region body
PF: predicated region fallthrough
CT: control target
= control target key end

     0   :  { %9 = vsyncpa [#allocation5], 0  ;;  %s783_s0 = inlined_call_operand.<no memory space> [shape: s32[1], index: 0, kind: input, shape index: {}]   ;;  %s784_s1 = inlined_call_operand.hbm [shape: f32[2,8,32], index: 1, kind: input, shape index: {}]   ;;  %s785_s2 = inlined_call_operand.hbm [shape: f32[8,32], index: 2, kind: input, shape index: {}]   ;;  %s786_s3 = inlined_call_operand.hbm [shape: f32[2,8,32], index: 3, kind: output, shape index: {}]  }
   0x1   :  { %11 = vsyncpa [#allocation5 + $0x1], 0 }
   0x2   :  { %12 = vsyncpa [#allocation8], 0 }
   0x3   :  { %13 = vsyncpa [#allocation6], 0 }
   0x4   :  { %15 = vsyncpa [#allocation6 + $0x1], 0  ;;  %s567_s12 = smov 0   ;;  %s569_s13 = smov 0  }
   0x5   :  { %s571_s14 = smov 0   ;;  %s573_s0 = smov 0  }
   0x6   :  { %s575_s15 = smov 0   ;;  %s577_s16 = smov 0  }
   0x7 LB: > { %s310_s17 = sadd.s32 4294967295, %s542_s16   ;;  %s311_s18 = sadd.s32 4294967294, %s542_s16   ;;  %s542_s16 = sphi %s577_s16, %s21_s16   ;;  %s538_s15 = sphi %s575_s15, %s811_s15   ;;  %s534_s0 = sphi %s573_s0, %s810_s0   ;;  %s530_s14 = sphi %s571_s14, %s809_s14   ;;  %s526_s13 = sphi %s569_s13, %s808_s13   ;;  %s522_s12 = sphi %s567_s12, %s807_s12  }
   0x8   : > { %p55_p0 = scmp.ne.s32.totalorder %s526_s13, %s522_s12  ;;  %p601_p1 = scmp.eq.s32.totalorder %s310_s17, 0 }
   0x9   : > { %p605_p2 = scmp.eq.s32.totalorder %s310_s17, 1  ;;  %p113_p3 = scmp.eq.s32.totalorder %s311_s18, 1 }
   0xa   : > { %s791_s19 = scalar_select %p601_p1, 1, 0 }
   0xb   : > { %s792_s20 = scalar_select %p605_p2, 1, 0 }
   0xc   : > { %p611_p4 = por %p601_p1, %p55_p0  ;;  %p312_p5 = scmp.ge.s32.totalorder %s542_s16, 1 }
   0xd   : > { %p616_p6 = por %p113_p3, %p55_p0  ;;  %p120_p7 = scmp.lt.s32.totalorder %s542_s16, 3 }
   0xe   : > { %s793_s21 = scalar_select %p611_p4, 1, 0 }
   0xf   : > { %s794_s22 = scalar_select %p616_p6, 1, 0 }
  0x10   : > { %p621_p8 = pnand %p312_p5, %p120_p7  ;;  %s544_s24 = smov [#allocation7]  }
  0x11   : > { %s135_s25 = sshll.u32 %s544_s24, 4  ;;  %s33_s27 = sadd.s32 1, %s538_s15  ;;  %s136_s25 = int_to_ptr.vmem [resolvable:$true] %s135_s25 }
  0x12   : > { %s795_s23 = scalar_select %p621_p8, 1, 0 }
  0x13   : > { %p333_p10 = pneg %p621_p8  ;;  %s42_s28 = sadd.s32 1, %s530_s14 }
  0x14   : > { %p636_p12 = scmp.ge.s32.totalorder %s33_s27, 2  ;;  %s398_s5 = scalar_lea.hbm %s785_s2, 128 }
  0x15   : > { %p630_p11 = pnand %p333_p10, %p601_p1  ;;  %p399_p13 = scmp.ne.s32.totalorder %s785_s2, %s398_s5 }
  0x16   : > { %s797_s29 = scalar_select %p636_p12, 1, 0 }
  0x17   : > { %p400_p0 = pneg %p630_p11  ;;  %p405_p7 = scmp.lt.u32.totalorder %s398_s5, %s785_s2 }
  0x19   : > { %p401_p3 = pnand %p400_p0, %p399_p13 }
  0x1b   : > { %p402_p5 = pneg %p401_p3 }
  0x1d   : > { %p407_p10 = pnand %p405_p7, %p402_p5 }
  0x1f   : > { %410 = shalt.err (!%p407_p10)
}
  0x20   : > { %s411_s10 = scalar_lea.vmem %s136_s25, 128  ;;  %p419_p4 = scmp.lt.s32.totalorder %s136_s25, %s136_s25 }
  0x21   : > { %p412_p9 = scmp.ne.s32.totalorder %s136_s25, %s411_s10  ;;  %p420_p8 = scmp.lt.s32.totalorder %s411_s10, %s411_s10 }
  0x23   : > { %p414_p6 = pnand %p412_p9, %p400_p0  ;;  %p421_p2 = por %p420_p8, %p419_p4 }
  0x25   : > { %p415_p1 = pneg %p414_p6 }
  0x27   : > { %p422_p12 = pnand %p421_p2, %p415_p1 }
  0x29   : > { %425 = shalt.err (!%p422_p12)
}
  0x2a   : > { %336 = dma.hbm_to_vmem [thread:$0]  (!%p630_p11), %s785_s2, 128, %s136_s25, [#allocation8]  }
  0x2b   : > { %p798_p4 = scmp.ne.s32.totalorder %s797_s29, 0  ;;  %p49_p1 = scmp.ne.s32.totalorder %s530_s14, %s526_s13 }
  0x2c   : > { %p50_p2 = scmp.eq.s32.totalorder %s542_s16, 0  ;;  %p346_p6 = scmp.lt.s32.totalorder %s542_s16, 2 }
  0x2d   : > { %s813_s27 = smov (%p798_p4, %s33_s27), 0  ;;  %p799_p12 = scmp.ne.s32.totalorder %s792_s20, 0 }
  0x2e   : > { %s37_s18 = ssub.s32 %s538_s15, %s813_s27  ;;  %p51_p9 = por %p50_p2, %p49_p1 }
  0x2f   : > { %p40_p8 = scmp.eq.s32.totalorder %s37_s18, 0  ;;  %p668_p13 = por %p799_p12, %p49_p1 }
  0x30   : > { %s146_s26 = sand.u32 1, %s530_s14   ;;  %s316_s29 = sshll.u32 %s538_s15, 7 }
  0x31   : > { %s676_s30 = scalar_select %p40_p8, %s530_s14, %s42_s28  }
  0x32   : > { %s315_s25 = sshll.u32 %s146_s26, 3  ;;  %s682_s6 = scalar_lea.hbm %s784_s1, %s316_s29 }
  0x33   : > { %s150_s20 = scalar_lea.vmem [#allocation4], %s315_s25  ;;  %p686_p11 = pnand %p346_p6, %p51_p9 }
  0x34   : > { %s158_s7 = sshll.u32 %s150_s20, 4  ;;  %s147_s28 = scalar_lea.sflag [#allocation5], %s146_s26  ;;  %s684_s7 = int_to_ptr.vmem [resolvable:$true] %s158_s7 }
  0x35   : > { %s426_s9 = scalar_lea.hbm %s682_s6, 128  ;;  %p428_p3 = pneg %p686_p11 }
  0x36   : > { %p427_p0 = scmp.ne.s32.totalorder %s682_s6, %s426_s9  ;;  %s431_s17 = scalar_lea.hbm %s784_s1, 256 }
  0x37   : > { %p432_p10 = scmp.lt.u32.totalorder %s682_s6, %s784_s1  ;;  %p433_p4 = scmp.lt.u32.totalorder %s431_s17, %s426_s9 }
  0x38   : > { %p429_p5 = pnand %p428_p3, %p427_p0  ;;  %p435_p2 = scmp.lt.u32.totalorder %s426_s9, %s682_s6 }
  0x39   : > { %p434_p1 = por %p433_p4, %p432_p10 }
  0x3a   : > { %p430_p7 = pneg %p429_p5 }
  0x3b   : > { %p436_p6 = por %p435_p2, %p434_p1 }
  0x3d   : > { %p437_p8 = pnand %p436_p6, %p430_p7 }
  0x3f   : > { %440 = shalt.err (!%p437_p8)
}
  0x40   : > { %s441_s26 = scalar_lea.vmem %s684_s7, 128  ;;  %s545_s29 = smov [#allocation4]  }
  0x41   : > { %p442_p9 = scmp.ne.s32.totalorder %s684_s7, %s441_s26  ;;  %s446_s4 = sshll.u32 %s545_s29, 4  ;;  %s447_s4 = int_to_ptr.vmem [resolvable:$false] %s446_s4 }
  0x42   : > { %s448_s5 = scalar_lea.vmem %s447_s4, 256  ;;  %p449_p5 = scmp.lt.s32.totalorder %s684_s7, %s447_s4 }
  0x43   : > { %p444_p12 = pnand %p442_p9, %p428_p3  ;;  %p450_p10 = scmp.lt.s32.totalorder %s448_s5, %s441_s26 }
  0x45   : > { %p445_p0 = pneg %p444_p12  ;;  %p451_p4 = por %p450_p10, %p449_p5 }
  0x47   : > { %p452_p1 = pnand %p451_p4, %p445_p0 }
  0x49   : > { %455 = shalt.err (!%p452_p1)
}
  0x4a   : > { %340 = dma.hbm_to_vmem [thread:$0]  (!%p686_p11), %s682_s6, 128, %s684_s7, %s147_s28  }
  0x4b   : > { %p802_p7 = scmp.ne.s32.totalorder %s795_s23, 0 }
  0x4c   : > { %s718_s20 = sand.u32 (!%p802_p7), 1, %s526_s13   ;;  %p803_p3 = scmp.ne.s32.totalorder (!%p802_p7), %s793_s21, 0 }
  0x4d   : > { %167 = sbr.rel (%p802_p7) target bundleno = 113 (0x71), region = 28  ;;  %s318_s9 = sshll.u32 (!%p802_p7), %s718_s20, 3 }
  0x4e   : > { %s170_s10 = scalar_lea.sflag (!%p802_p7), [#allocation5], %s718_s20  ;;  %s173_s11 = scalar_lea.vmem (!%p802_p7), [#allocation4], %s318_s9 }
  0x54   : > { %509 = dma.done.wait (%p803_p3), %s170_s10, 128  }
  0x55   : > { %511 = vsyncadd (%p803_p3), %s170_s10, 4294967168  ;;  %p804_p2 = scmp.ne.s32.totalorder %s791_s19, 0 }
  0x57   : > { %513 = dma.done.wait (%p804_p2), [#allocation8], 128  }
  0x58   : > { %515 = vsyncadd (%p804_p2), [#allocation8], 4294967168  ;;  %s197_s23 = scalar_lea.vmem [#allocation9], %s318_s9  ;;  %s322_s7 = sshll.u32 %s534_s0, 7  ;;  %v198_v0 = vld [vmem:[%s173_s11] sm:$0xff]  ;;  %v199_v1 = vld [vmem:[#allocation7] sm:$0xff] }
  0x59   : > { %s218_s6 = sshll.u32 %s197_s23, 4  ;;  %vm201_vm0 = vcmask 261120   ;;  %v200_v2 = vadd.f32 %v199_v1, %v198_v0  ;;  %s736_s19 = scalar_lea.hbm %s786_s3, %s322_s7  ;;  %s731_s6 = int_to_ptr.vmem [resolvable:$true] %s218_s6 }
  0x5a   : > { %s204_s28 = scalar_lea.sflag [#allocation6], %s718_s20  ;;  %s456_s17 = scalar_lea.vmem %s731_s6, 128 }
  0x5b   : > { %202 = vst.msk [vmem:[%s197_s23] sm:$0xff] %vm201_vm0, %v200_v2  ;;  %p457_p11 = scmp.ne.s32.totalorder %s731_s6, %s456_s17  ;;  %s546_s0 = smov [#allocation9]  }
  0x5c   : > { %s460_s18 = sshll.u32 %s546_s0, 4  ;;  %s461_s18 = int_to_ptr.vmem [resolvable:$false] %s460_s18 }
  0x5d   : > { %p458_p6 = pnand %p457_p11, %p668_p13  ;;  %s462_s25 = scalar_lea.vmem %s461_s18, 256 }
  0x5e   : > { %p463_p9 = scmp.lt.s32.totalorder %s731_s6, %s461_s18  ;;  %p464_p12 = scmp.lt.s32.totalorder %s462_s25, %s456_s17 }
  0x5f   : > { %p459_p8 = pneg %p458_p6 }
  0x60   : > { %p465_p0 = por %p464_p12, %p463_p9 }
  0x62   : > { %p466_p5 = pnand %p465_p0, %p459_p8 }
  0x64   : > { %469 = shalt.err (!%p466_p5)
}
  0x65   : > { %s470_s26 = scalar_lea.hbm %s736_s19, 128  ;;  %s474_s5 = scalar_lea.hbm %s786_s3, 256 }
  0x66   : > { %p471_p10 = scmp.ne.s32.totalorder %s736_s19, %s470_s26  ;;  %p475_p7 = scmp.lt.u32.totalorder %s736_s19, %s786_s3 }
  0x67   : > { %p476_p3 = scmp.lt.u32.totalorder %s474_s5, %s470_s26  ;;  %p478_p11 = scmp.lt.u32.totalorder %s470_s26, %s736_s19 }
  0x68   : > { %p472_p4 = pnand %p471_p10, %p668_p13 }
  0x69   : > { %p477_p2 = por %p476_p3, %p475_p7 }
  0x6a   : > { %p473_p1 = pneg %p472_p4 }
  0x6b   : > { %p479_p6 = por %p478_p11, %p477_p2 }
  0x6d   : > { %p480_p8 = pnand %p479_p6, %p473_p1 }
  0x6f   : > { %483 = shalt.err (!%p480_p8)
}
  0x70   : > { %331 = dma.vmem_to_hbm [thread:$0]  (%p668_p13), %s731_s6, 128, %s736_s19, %s204_s28  }
  0x71 PF: > { %s230_s10 = sand.u32 1, %s522_s12   ;;  %p805_p9 = scmp.ne.s32.totalorder %s794_s22, 0 }
  0x72   : > { %p806_p12 = scmp.ge.s32.totalorder %s542_s16, 2  ;;  %s231_s11 = scalar_lea.sflag [#allocation6], %s230_s10 }
  0x74   : > { %p342_p0 = pnand %p806_p12, %p805_p9 }
  0x76   : > { %517 = dma.done.wait (!%p342_p0), %s231_s11, 128  }
  0x77   : > { %519 = vsyncadd (!%p342_p0), %s231_s11, 4294967168  ;;  %s21_s16 = sadd.s32 1, %s542_s16   ;;  %s807_s12 = smov %s526_s13 }
  0x78   : > { %p18_p5 = scmp.ge.s32.totalorder %s21_s16, 4   ;;  %s808_s13 = smov %s530_s14 }
  0x79   : > { %s809_s14 = smov %s676_s30  ;;  %s810_s0 = smov %s538_s15 }
  0x7a   : > { %s811_s15 = smov %s813_s27  ;;  %20 = sbr.rel (!%p18_p5) target bundleno = 7 (0x7), region = 78 }
  0x81   :  { %236 = vsyncpa [#allocation5], 1 }
  0x82   :  { %238 = vsyncpa [#allocation5 + $0x1], 1 }
  0x83   :  { %239 = vsyncpa [#allocation8], 1 }
  0x84   :  { %240 = vsyncpa [#allocation6], 1 }
  0x85   :  { %242 = vsyncpa [#allocation6 + $0x1], 1 }

</bundles_post_ra>
